<compile_context>
chip_gen: v5e
topology: v5e:2x2
jax: 0.10.0
libtpu: 0.0.40
codegen_flags: <defaults>
</compile_context>

<pallas_src>
import functools

import jax
import jax.numpy as jnp
from jax import lax
from jax.experimental import pallas as pl
from jax.experimental.pallas import tpu as pltpu

# ---- "config" (mirrors the module's global config object) -------------------
MASK_SIZE = 16            # config.mask_size
ANGLE_RES = 7             # config.angle_res
NUM_CLASSES = ANGLE_RES + 1
P_WEIGHT = 3.0            # config.p_weight (scalar elementwise BCE weight)
USE_ROTATION = True       # config.use_rotation
POS_W = 0.99              # pw in the module

LANES = 128
NUM_ACC = 4               # [bce_sum, ce_sum, ce_pos_sum, pos_count]


def _round_up(x, m):
    return -(-x // m) * m


def _fold_rows(v):
    """(tile_r, 128) f32 -> (8, 128) partial sums.  Pure VPU (vreg-aligned)."""
    r, lanes = v.shape
    rem = r % 8
    if rem:
        v = jnp.concatenate([v, jnp.zeros((8 - rem, lanes), v.dtype)], axis=0)
        r += 8 - rem
    return v.reshape(r // 8, 8, lanes).sum(axis=0)


def _spnet_loss_kernel(bp_ref, bt_ref, rp_ref, rt_ref, out_ref, acc_ref,
                       *, rows, tiles_per_core, need_mask):
    step = pl.program_id(1)

    @pl.when(step == 0)
    def _init():
        acc_ref[...] = jnp.zeros_like(acc_ref)

    x = bp_ref[...].astype(jnp.float32)          # (tile_r, 128) logits
    t = bt_ref[...].astype(jnp.float32)          # (tile_r, 128) targets {0,1}
    tile_r = x.shape[0]

    # Row-validity mask (cells are lane-dense and nm % 128 == 0, so validity
    # is uniform across lanes).  Select (not multiply) so garbage in the
    # out-of-bounds part of a tail tile can never poison the accumulators.
    if need_mask:
        core = pl.program_id(0)
        row0 = (core * tiles_per_core + step) * tile_r
        rid = row0 + lax.broadcasted_iota(jnp.int32, (tile_r, 1), 0)
        valid = rid < rows                        # (tile_r, 1) bool
    else:
        valid = None

    # ---- binary_cross_entropy_with_logits (stable form), summed per lane ---
    bce = jnp.maximum(x, 0.0) - x * t + jnp.log1p(jnp.exp(-jnp.abs(x)))
    if valid is not None:
        bce = jnp.where(valid, bce, 0.0)
        posf = jnp.where(valid, t, 0.0)           # targets are hard {0,1}
    else:
        posf = t
    acc_ref[0] += _fold_rows(bce)

    if USE_ROTATION:
        # ---- per-cell cross entropy, unrolled over the 8 angle classes -----
        tgt = rt_ref[...].astype(jnp.int32)       # (tile_r, 128)
        m = rp_ref[0]                             # running max (native dtype)
        for c in range(1, NUM_CLASSES):
            m = jnp.maximum(m, rp_ref[c])
        m = m.astype(jnp.float32)

        s = None
        picked_d = None                           # (picked logit) - max
        for c in range(NUM_CLASSES):
            d = rp_ref[c].astype(jnp.float32) - m
            e = jnp.exp(d)
            pk = jnp.where(tgt == c, d, 0.0)
            s = e if s is None else s + e
            picked_d = pk if picked_d is None else picked_d + pk
        ce = jnp.log(s) - picked_d                # lse - picked, per cell
        if valid is not None:
            ce = jnp.where(valid, ce, 0.0)

        acc_ref[1] += _fold_rows(ce)
        acc_ref[2] += _fold_rows(ce * posf)
        acc_ref[3] += _fold_rows(posf)

    @pl.when(step == pl.num_programs(1) - 1)
    def _finalize():
        out_ref[0] = acc_ref[...]


def spnet_loss(bmask_preds, bmask_targets, rmask_preds, rmask_targets, *,
               class_major=False, max_tile_rows=1024, num_cores=2):
    """SPNetLoss forward.  Inputs may be bf16 / f32; rmask_targets may be any
    int or float dtype (int8 is cheapest).  If `class_major` is True,
    rmask_preds must have the class axis leading (C, ...) -- the preferred,
    transpose-free layout."""
    m2 = MASK_SIZE ** 2
    nm = bmask_preds.size
    assert nm % m2 == 0 and nm % LANES == 0, "cell count must be /128"
    rows = nm // LANES

    bp = bmask_preds.reshape(rows, LANES)
    bt = bmask_targets.reshape(rows, LANES)
    rt = rmask_targets.reshape(rows, LANES)
    if class_major:
        assert rmask_preds.shape[0] == NUM_CLASSES
        rp = rmask_preds.reshape(NUM_CLASSES, rows, LANES)
    else:
        # Natural module layout (..., C): one narrow-dtype transpose pass.
        # Prefer class_major=True from the producer to avoid it.
        rp = rmask_preds.reshape(-1, NUM_CLASSES).T.reshape(
            NUM_CLASSES, rows, LANES)

    # ---- tiling / core split ------------------------------------------------
    ncores = num_cores if (rows >= 64 and num_cores > 1) else 1
    rows_per_core = pl.cdiv(rows, ncores)
    if rows < 32:
        tile_r = rows                              # full-dim block (tiny case)
    else:
        tile_r = min(max_tile_rows,
                     _round_up(rows_per_core, 32),
                     (rows // 32) * 32)            # 32-aligned, <= rows
    tiles_per_core = pl.cdiv(rows_per_core, tile_r)
    covered = ncores * tiles_per_core * tile_r
    need_mask = covered != rows

    kernel = functools.partial(_spnet_loss_kernel, rows=rows,
                               tiles_per_core=tiles_per_core,
                               need_mask=need_mask)

    def row_map(c, i):
        return (c * tiles_per_core + i, 0)

    def rp_map(c, i):
        return (0, c * tiles_per_core + i, 0)

    part = pl.pallas_call(
        kernel,
        out_shape=jax.ShapeDtypeStruct((ncores, NUM_ACC, 8, LANES),
                                       jnp.float32),
        grid=(ncores, tiles_per_core),
        in_specs=[
            pl.BlockSpec((tile_r, LANES), row_map),
            pl.BlockSpec((tile_r, LANES), row_map),
            pl.BlockSpec((NUM_CLASSES, tile_r, LANES), rp_map),
            pl.BlockSpec((tile_r, LANES), row_map),
        ],
        out_specs=pl.BlockSpec((1, NUM_ACC, 8, LANES),
                               lambda c, i: (c, 0, 0, 0)),
        scratch_shapes=[pltpu.VMEM((NUM_ACC, 8, LANES), jnp.float32)],
        compiler_params=pltpu.CompilerParams(
            dimension_semantics=("parallel", "arbitrary"),
            vmem_limit_bytes=32 * 1024 * 1024),
    )(bp, bt, rp, rt)

    # ---- tiny scalar combine (per-core partial sums -> three losses) --------
    sums = jnp.sum(part, axis=(0, 2, 3))           # (4,)
    nm_f = jnp.float32(nm)
    bmask_loss = jnp.float32(P_WEIGHT) * sums[0] / nm_f
    if USE_ROTATION:
        ce_sum, ce_pos_sum, pos_count = sums[1], sums[2], sums[3]
        neg_count = nm_f - pos_count
        # masked mean == F.cross_entropy mean over the selected cells.
        # Empty selections yield 0 (PyTorch's empty-negative case gives NaN).
        rloss_pos = jnp.where(pos_count > 0.0,
                              ce_pos_sum / jnp.maximum(pos_count, 1.0), 0.0)
        rloss_neg = jnp.where(neg_count > 0.0,
                              (ce_sum - ce_pos_sum)
                              / jnp.maximum(neg_count, 1.0), 0.0)
        rmask_loss = (jnp.float32(POS_W) * rloss_pos
                      + jnp.float32(1.0 - POS_W) * rloss_neg)
    else:
        rmask_loss = jnp.float32(0.0)
    loss = bmask_loss + rmask_loss
    return loss, bmask_loss, rmask_loss


# ---- pure-JAX reference (mirrors the PyTorch semantics) ---------------------
def spnet_loss_ref(bmask_preds, bmask_targets, rmask_preds, rmask_targets):
    m2 = MASK_SIZE ** 2
    x = bmask_preds.reshape(-1, m2).astype(jnp.float32)
    t = bmask_targets.reshape(-1, m2).astype(jnp.float32)
    bce = jnp.maximum(x, 0.0) - x * t + jnp.log1p(jnp.exp(-jnp.abs(x)))
    bmask_loss = P_WEIGHT * jnp.mean(bce)

    logits = rmask_preds.reshape(-1, NUM_CLASSES).astype(jnp.float32)
    tgt = rmask_targets.reshape(-1).astype(jnp.int32)
    lse = jax.nn.logsumexp(logits, axis=-1)
    picked = jnp.take_along_axis(logits, tgt[:, None], axis=-1)[:, 0]
    ce = lse - picked
    posf = (t.reshape(-1) == 1.0).astype(jnp.float32)
    pc = jnp.sum(posf)
    nc = posf.size - pc
    rpos = jnp.where(pc > 0, jnp.sum(ce * posf) / jnp.maximum(pc, 1.0), 0.0)
    rneg = jnp.where(nc > 0,
                     jnp.sum(ce * (1 - posf)) / jnp.maximum(nc, 1.0), 0.0)
    rmask_loss = POS_W * rpos + (1.0 - POS_W) * rneg
    return bmask_loss + rmask_loss, bmask_loss, rmask_loss


if __name__ == "__main__":
    def make_inputs(key, n, tgt_dtype):
        k1, k2, k3, k4 = jax.random.split(key, 4)
        bp = jax.random.normal(
            k1, (n, MASK_SIZE, MASK_SIZE), jnp.float32).astype(jnp.bfloat16)
        bt = jax.random.bernoulli(
            k2, 0.3, (n, MASK_SIZE, MASK_SIZE)).astype(jnp.bfloat16)
        rp = jax.random.normal(
            k3, (n, MASK_SIZE ** 2, NUM_CLASSES), jnp.float32
        ).astype(jnp.bfloat16)
        rt = jax.random.randint(
            k4, (n, MASK_SIZE, MASK_SIZE), 0, NUM_CLASSES,
            jnp.int32).astype(tgt_dtype)
        return bp, bt, rp, rt

    key = jax.random.PRNGKey(0)
    keys = jax.random.split(key, 3)
    # (batch, target dtype): tiny full-dim tile / masked-tail tile / 2-core split
    configs = [(2, jnp.int32), (20, jnp.int8), (32, jnp.int8)]

    for kk, (n, tdt) in zip(keys, configs):
        bp, bt, rp, rt = make_inputs(kk, n, tdt)
        ref = spnet_loss_ref(bp, bt, rp, rt)
        # Preferred path: class-major rmask_preds produced "upstream".
        rp_cm = jnp.moveaxis(rp, -1, 0)
        out = jax.block_until_ready(
            spnet_loss(bp, bt, rp_cm, rt, class_major=True))
        for a, b in zip(out, ref):
            assert jnp.allclose(a, b, atol=1e-5, rtol=1e-5), (n, a, b)

    # Natural (module) layout path, smallest config.
    bp, bt, rp, rt = make_inputs(keys[0], 2, jnp.int32)
    out = jax.block_until_ready(spnet_loss(bp, bt, rp, rt))
    ref = spnet_loss_ref(bp, bt, rp, rt)
    for a, b in zip(out, ref):
        assert jnp.allclose(a, b, atol=1e-5, rtol=1e-5), (a, b)

    print("KERNEL_OK")
</pallas_src>

<mosaic_0001>
module attributes {stable_mosaic.version = 11 : i64} {
  func.func @_spnet_loss_kernel(%arg0: i32, %arg1: i32, %arg2: memref<4x128xbf16, #tpu.memory_space<vmem>>, %arg3: memref<4x128xbf16, #tpu.memory_space<vmem>>, %arg4: memref<8x4x128xbf16, #tpu.memory_space<vmem>>, %arg5: memref<4x128xi32, #tpu.memory_space<vmem>>, %arg6: memref<1x4x8x128xf32, #tpu.memory_space<vmem>>, %arg7: memref<4x8x128xf32, #tpu.memory_space<vmem>>) attributes {dimension_semantics = [#tpu.dimension_semantics<parallel>, #tpu.dimension_semantics<arbitrary>], iteration_bounds = array<i64: 1, 1>, scalar_prefetch = 0 : i64, scratch_operands = 1 : i64, tpu.core_type = #tpu.core_type<tc>, window_params = [{transform_indices = @transform_0, window_bounds = array<i64: 4, 128>}, {transform_indices = @transform_1, window_bounds = array<i64: 4, 128>}, {transform_indices = @transform_2, window_bounds = array<i64: 8, 4, 128>}, {transform_indices = @transform_3, window_bounds = array<i64: 4, 128>}, {transform_indices = @transform_4, window_bounds = array<i64: 1, 4, 8, 128>}]} {
    %c0_i32 = arith.constant 0 : i32
    %0 = arith.cmpi eq, %arg1, %c0_i32 : i32
    %1 = arith.extui %0 : i1 to i32
    %c0_i32_0 = arith.constant 0 : i32
    %2 = arith.cmpi ne, %1, %c0_i32_0 : i32
    scf.if %2 {
      %cst_91 = arith.constant 0.000000e+00 : f32
      %174 = vector.broadcast %cst_91 : f32 to vector<4x8x128xf32>
      %c0_92 = arith.constant 0 : index
      %c0_93 = arith.constant 0 : index
      %c0_94 = arith.constant 0 : index
      %175 = vector.load %arg7[%c0_92, %c0_93, %c0_94] : memref<4x8x128xf32, #tpu.memory_space<vmem>>, vector<4x8x128xf32>
      tpu.vector_store %arg7[%c0_92, %c0_93, %c0_94], %174 {strides = array<i32>} : memref<4x8x128xf32, #tpu.memory_space<vmem>>, vector<4x8x128xf32>,
    } else {
    }
    %c0 = arith.constant 0 : index
    %c0_1 = arith.constant 0 : index
    %3 = vector.load %arg2[%c0, %c0_1] : memref<4x128xbf16, #tpu.memory_space<vmem>>, vector<4x128xbf16>
    %4 = arith.extf %3 : vector<4x128xbf16> to vector<4x128xf32>
    %c0_2 = arith.constant 0 : index
    %c0_3 = arith.constant 0 : index
    %5 = vector.load %arg3[%c0_2, %c0_3] : memref<4x128xbf16, #tpu.memory_space<vmem>>, vector<4x128xbf16>
    %6 = arith.extf %5 : vector<4x128xbf16> to vector<4x128xf32>
    %cst = arith.constant 0.000000e+00 : f32
    %7 = vector.broadcast %cst : f32 to vector<4x128xf32>
    %8 = arith.maximumf %4, %7 : vector<4x128xf32>
    %9 = arith.mulf %4, %6 : vector<4x128xf32>
    %10 = arith.subf %8, %9 : vector<4x128xf32>
    %11 = math.absf %4 : vector<4x128xf32>
    %cst_4 = arith.constant 0.000000e+00 : f32
    %12 = vector.broadcast %cst_4 : f32 to vector<4x128xf32>
    %13 = arith.subf %12, %11 : vector<4x128xf32>
    %14 = math.exp %13 : vector<4x128xf32>
    %15 = math.log1p %14 : vector<4x128xf32>
    %16 = arith.addf %10, %15 : vector<4x128xf32>
    %c0_5 = arith.constant 0 : index
    %c0_6 = arith.constant 0 : index
    %c0_7 = arith.constant 0 : index
    %17 = vector.load %arg7[%c0_5, %c0_6, %c0_7] : memref<4x8x128xf32, #tpu.memory_space<vmem>>, vector<1x8x128xf32>
    %18 = vector.shape_cast %17 : vector<1x8x128xf32> to vector<8x128xf32>
    %cst_8 = arith.constant 0.000000e+00 : f32
    %19 = vector.broadcast %cst_8 : f32 to vector<4x128xf32>
    %20 = tpu.concatenate %16, %19 in 0 : vector<4x128xf32>, vector<4x128xf32> -> vector<8x128xf32>
    %21 = vector.shape_cast %20 : vector<8x128xf32> to vector<1x8x128xf32>
    %cst_9 = arith.constant dense<0.000000e+00> : vector<8x128xf32>
    %22 = vector.multi_reduction <add>, %21, %cst_9 [0] : vector<1x8x128xf32> to vector<8x128xf32>
    %23 = arith.addf %18, %22 : vector<8x128xf32>
    %c0_10 = arith.constant 0 : index
    %c0_11 = arith.constant 0 : index
    %c0_12 = arith.constant 0 : index
    %24 = vector.load %arg7[%c0_10, %c0_11, %c0_12] : memref<4x8x128xf32, #tpu.memory_space<vmem>>, vector<1x8x128xf32>
    %25 = vector.shape_cast %24 : vector<1x8x128xf32> to vector<8x128xf32>
    %26 = vector.shape_cast %23 : vector<8x128xf32> to vector<1x8x128xf32>
    tpu.vector_store %arg7[%c0_10, %c0_11, %c0_12], %26 {strides = array<i32>} : memref<4x8x128xf32, #tpu.memory_space<vmem>>, vector<1x8x128xf32>,
    %c0_13 = arith.constant 0 : index
    %c0_14 = arith.constant 0 : index
    %27 = vector.load %arg5[%c0_13, %c0_14] : memref<4x128xi32, #tpu.memory_space<vmem>>, vector<4x128xi32>
    %c0_15 = arith.constant 0 : index
    %c0_16 = arith.constant 0 : index
    %c0_17 = arith.constant 0 : index
    %28 = vector.load %arg4[%c0_15, %c0_16, %c0_17] : memref<8x4x128xbf16, #tpu.memory_space<vmem>>, vector<1x4x128xbf16>
    %29 = vector.shape_cast %28 : vector<1x4x128xbf16> to vector<4x128xbf16>
    %c1 = arith.constant 1 : index
    %c0_18 = arith.constant 0 : index
    %c0_19 = arith.constant 0 : index
    %30 = vector.load %arg4[%c1, %c0_18, %c0_19] : memref<8x4x128xbf16, #tpu.memory_space<vmem>>, vector<1x4x128xbf16>
    %31 = vector.shape_cast %30 : vector<1x4x128xbf16> to vector<4x128xbf16>
    %32 = arith.maximumf %29, %31 : vector<4x128xbf16>
    %c2 = arith.constant 2 : index
    %c0_20 = arith.constant 0 : index
    %c0_21 = arith.constant 0 : index
    %33 = vector.load %arg4[%c2, %c0_20, %c0_21] : memref<8x4x128xbf16, #tpu.memory_space<vmem>>, vector<1x4x128xbf16>
    %34 = vector.shape_cast %33 : vector<1x4x128xbf16> to vector<4x128xbf16>
    %35 = arith.maximumf %32, %34 : vector<4x128xbf16>
    %c3 = arith.constant 3 : index
    %c0_22 = arith.constant 0 : index
    %c0_23 = arith.constant 0 : index
    %36 = vector.load %arg4[%c3, %c0_22, %c0_23] : memref<8x4x128xbf16, #tpu.memory_space<vmem>>, vector<1x4x128xbf16>
    %37 = vector.shape_cast %36 : vector<1x4x128xbf16> to vector<4x128xbf16>
    %38 = arith.maximumf %35, %37 : vector<4x128xbf16>
    %c4 = arith.constant 4 : index
    %c0_24 = arith.constant 0 : index
    %c0_25 = arith.constant 0 : index
    %39 = vector.load %arg4[%c4, %c0_24, %c0_25] : memref<8x4x128xbf16, #tpu.memory_space<vmem>>, vector<1x4x128xbf16>
    %40 = vector.shape_cast %39 : vector<1x4x128xbf16> to vector<4x128xbf16>
    %41 = arith.maximumf %38, %40 : vector<4x128xbf16>
    %c5 = arith.constant 5 : index
    %c0_26 = arith.constant 0 : index
    %c0_27 = arith.constant 0 : index
    %42 = vector.load %arg4[%c5, %c0_26, %c0_27] : memref<8x4x128xbf16, #tpu.memory_space<vmem>>, vector<1x4x128xbf16>
    %43 = vector.shape_cast %42 : vector<1x4x128xbf16> to vector<4x128xbf16>
    %44 = arith.maximumf %41, %43 : vector<4x128xbf16>
    %c6 = arith.constant 6 : index
    %c0_28 = arith.constant 0 : index
    %c0_29 = arith.constant 0 : index
    %45 = vector.load %arg4[%c6, %c0_28, %c0_29] : memref<8x4x128xbf16, #tpu.memory_space<vmem>>, vector<1x4x128xbf16>
    %46 = vector.shape_cast %45 : vector<1x4x128xbf16> to vector<4x128xbf16>
    %47 = arith.maximumf %44, %46 : vector<4x128xbf16>
    %c7 = arith.constant 7 : index
    %c0_30 = arith.constant 0 : index
    %c0_31 = arith.constant 0 : index
    %48 = vector.load %arg4[%c7, %c0_30, %c0_31] : memref<8x4x128xbf16, #tpu.memory_space<vmem>>, vector<1x4x128xbf16>
    %49 = vector.shape_cast %48 : vector<1x4x128xbf16> to vector<4x128xbf16>
    %50 = arith.maximumf %47, %49 : vector<4x128xbf16>
    %51 = arith.extf %50 : vector<4x128xbf16> to vector<4x128xf32>
    %c0_32 = arith.constant 0 : index
    %c0_33 = arith.constant 0 : index
    %c0_34 = arith.constant 0 : index
    %52 = vector.load %arg4[%c0_32, %c0_33, %c0_34] : memref<8x4x128xbf16, #tpu.memory_space<vmem>>, vector<1x4x128xbf16>
    %53 = vector.shape_cast %52 : vector<1x4x128xbf16> to vector<4x128xbf16>
    %54 = arith.extf %53 : vector<4x128xbf16> to vector<4x128xf32>
    %55 = arith.subf %54, %51 : vector<4x128xf32>
    %56 = math.exp %55 : vector<4x128xf32>
    %c0_i32_35 = arith.constant 0 : i32
    %57 = vector.broadcast %c0_i32_35 : i32 to vector<4x128xi32>
    %58 = arith.cmpi eq, %27, %57 : vector<4x128xi32>
    %cst_36 = arith.constant 0.000000e+00 : f32
    %59 = vector.broadcast %cst_36 : f32 to vector<4x128xf32>
    %60 = arith.select %58, %55, %59 : vector<4x128xi1>, vector<4x128xf32>
    %c1_37 = arith.constant 1 : index
    %c0_38 = arith.constant 0 : index
    %c0_39 = arith.constant 0 : index
    %61 = vector.load %arg4[%c1_37, %c0_38, %c0_39] : memref<8x4x128xbf16, #tpu.memory_space<vmem>>, vector<1x4x128xbf16>
    %62 = vector.shape_cast %61 : vector<1x4x128xbf16> to vector<4x128xbf16>
    %63 = arith.extf %62 : vector<4x128xbf16> to vector<4x128xf32>
    %64 = arith.subf %63, %51 : vector<4x128xf32>
    %65 = math.exp %64 : vector<4x128xf32>
    %c1_i32 = arith.constant 1 : i32
    %66 = vector.broadcast %c1_i32 : i32 to vector<4x128xi32>
    %67 = arith.cmpi eq, %27, %66 : vector<4x128xi32>
    %cst_40 = arith.constant 0.000000e+00 : f32
    %68 = vector.broadcast %cst_40 : f32 to vector<4x128xf32>
    %69 = arith.select %67, %64, %68 : vector<4x128xi1>, vector<4x128xf32>
    %70 = arith.addf %56, %65 : vector<4x128xf32>
    %71 = arith.addf %60, %69 : vector<4x128xf32>
    %c2_41 = arith.constant 2 : index
    %c0_42 = arith.constant 0 : index
    %c0_43 = arith.constant 0 : index
    %72 = vector.load %arg4[%c2_41, %c0_42, %c0_43] : memref<8x4x128xbf16, #tpu.memory_space<vmem>>, vector<1x4x128xbf16>
    %73 = vector.shape_cast %72 : vector<1x4x128xbf16> to vector<4x128xbf16>
    %74 = arith.extf %73 : vector<4x128xbf16> to vector<4x128xf32>
    %75 = arith.subf %74, %51 : vector<4x128xf32>
    %76 = math.exp %75 : vector<4x128xf32>
    %c2_i32 = arith.constant 2 : i32
    %77 = vector.broadcast %c2_i32 : i32 to vector<4x128xi32>
    %78 = arith.cmpi eq, %27, %77 : vector<4x128xi32>
    %cst_44 = arith.constant 0.000000e+00 : f32
    %79 = vector.broadcast %cst_44 : f32 to vector<4x128xf32>
    %80 = arith.select %78, %75, %79 : vector<4x128xi1>, vector<4x128xf32>
    %81 = arith.addf %70, %76 : vector<4x128xf32>
    %82 = arith.addf %71, %80 : vector<4x128xf32>
    %c3_45 = arith.constant 3 : index
    %c0_46 = arith.constant 0 : index
    %c0_47 = arith.constant 0 : index
    %83 = vector.load %arg4[%c3_45, %c0_46, %c0_47] : memref<8x4x128xbf16, #tpu.memory_space<vmem>>, vector<1x4x128xbf16>
    %84 = vector.shape_cast %83 : vector<1x4x128xbf16> to vector<4x128xbf16>
    %85 = arith.extf %84 : vector<4x128xbf16> to vector<4x128xf32>
    %86 = arith.subf %85, %51 : vector<4x128xf32>
    %87 = math.exp %86 : vector<4x128xf32>
    %c3_i32 = arith.constant 3 : i32
    %88 = vector.broadcast %c3_i32 : i32 to vector<4x128xi32>
    %89 = arith.cmpi eq, %27, %88 : vector<4x128xi32>
    %cst_48 = arith.constant 0.000000e+00 : f32
    %90 = vector.broadcast %cst_48 : f32 to vector<4x128xf32>
    %91 = arith.select %89, %86, %90 : vector<4x128xi1>, vector<4x128xf32>
    %92 = arith.addf %81, %87 : vector<4x128xf32>
    %93 = arith.addf %82, %91 : vector<4x128xf32>
    %c4_49 = arith.constant 4 : index
    %c0_50 = arith.constant 0 : index
    %c0_51 = arith.constant 0 : index
    %94 = vector.load %arg4[%c4_49, %c0_50, %c0_51] : memref<8x4x128xbf16, #tpu.memory_space<vmem>>, vector<1x4x128xbf16>
    %95 = vector.shape_cast %94 : vector<1x4x128xbf16> to vector<4x128xbf16>
    %96 = arith.extf %95 : vector<4x128xbf16> to vector<4x128xf32>
    %97 = arith.subf %96, %51 : vector<4x128xf32>
    %98 = math.exp %97 : vector<4x128xf32>
    %c4_i32 = arith.constant 4 : i32
    %99 = vector.broadcast %c4_i32 : i32 to vector<4x128xi32>
    %100 = arith.cmpi eq, %27, %99 : vector<4x128xi32>
    %cst_52 = arith.constant 0.000000e+00 : f32
    %101 = vector.broadcast %cst_52 : f32 to vector<4x128xf32>
    %102 = arith.select %100, %97, %101 : vector<4x128xi1>, vector<4x128xf32>
    %103 = arith.addf %92, %98 : vector<4x128xf32>
    %104 = arith.addf %93, %102 : vector<4x128xf32>
    %c5_53 = arith.constant 5 : index
    %c0_54 = arith.constant 0 : index
    %c0_55 = arith.constant 0 : index
    %105 = vector.load %arg4[%c5_53, %c0_54, %c0_55] : memref<8x4x128xbf16, #tpu.memory_space<vmem>>, vector<1x4x128xbf16>
    %106 = vector.shape_cast %105 : vector<1x4x128xbf16> to vector<4x128xbf16>
    %107 = arith.extf %106 : vector<4x128xbf16> to vector<4x128xf32>
    %108 = arith.subf %107, %51 : vector<4x128xf32>
    %109 = math.exp %108 : vector<4x128xf32>
    %c5_i32 = arith.constant 5 : i32
    %110 = vector.broadcast %c5_i32 : i32 to vector<4x128xi32>
    %111 = arith.cmpi eq, %27, %110 : vector<4x128xi32>
    %cst_56 = arith.constant 0.000000e+00 : f32
    %112 = vector.broadcast %cst_56 : f32 to vector<4x128xf32>
    %113 = arith.select %111, %108, %112 : vector<4x128xi1>, vector<4x128xf32>
    %114 = arith.addf %103, %109 : vector<4x128xf32>
    %115 = arith.addf %104, %113 : vector<4x128xf32>
    %c6_57 = arith.constant 6 : index
    %c0_58 = arith.constant 0 : index
    %c0_59 = arith.constant 0 : index
    %116 = vector.load %arg4[%c6_57, %c0_58, %c0_59] : memref<8x4x128xbf16, #tpu.memory_space<vmem>>, vector<1x4x128xbf16>
    %117 = vector.shape_cast %116 : vector<1x4x128xbf16> to vector<4x128xbf16>
    %118 = arith.extf %117 : vector<4x128xbf16> to vector<4x128xf32>
    %119 = arith.subf %118, %51 : vector<4x128xf32>
    %120 = math.exp %119 : vector<4x128xf32>
    %c6_i32 = arith.constant 6 : i32
    %121 = vector.broadcast %c6_i32 : i32 to vector<4x128xi32>
    %122 = arith.cmpi eq, %27, %121 : vector<4x128xi32>
    %cst_60 = arith.constant 0.000000e+00 : f32
    %123 = vector.broadcast %cst_60 : f32 to vector<4x128xf32>
    %124 = arith.select %122, %119, %123 : vector<4x128xi1>, vector<4x128xf32>
    %125 = arith.addf %114, %120 : vector<4x128xf32>
    %126 = arith.addf %115, %124 : vector<4x128xf32>
    %c7_61 = arith.constant 7 : index
    %c0_62 = arith.constant 0 : index
    %c0_63 = arith.constant 0 : index
    %127 = vector.load %arg4[%c7_61, %c0_62, %c0_63] : memref<8x4x128xbf16, #tpu.memory_space<vmem>>, vector<1x4x128xbf16>
    %128 = vector.shape_cast %127 : vector<1x4x128xbf16> to vector<4x128xbf16>
    %129 = arith.extf %128 : vector<4x128xbf16> to vector<4x128xf32>
    %130 = arith.subf %129, %51 : vector<4x128xf32>
    %131 = math.exp %130 : vector<4x128xf32>
    %c7_i32 = arith.constant 7 : i32
    %132 = vector.broadcast %c7_i32 : i32 to vector<4x128xi32>
    %133 = arith.cmpi eq, %27, %132 : vector<4x128xi32>
    %cst_64 = arith.constant 0.000000e+00 : f32
    %134 = vector.broadcast %cst_64 : f32 to vector<4x128xf32>
    %135 = arith.select %133, %130, %134 : vector<4x128xi1>, vector<4x128xf32>
    %136 = arith.addf %125, %131 : vector<4x128xf32>
    %137 = arith.addf %126, %135 : vector<4x128xf32>
    %138 = math.log %136 : vector<4x128xf32>
    %139 = arith.subf %138, %137 : vector<4x128xf32>
    %c1_65 = arith.constant 1 : index
    %c0_66 = arith.constant 0 : index
    %c0_67 = arith.constant 0 : index
    %140 = vector.load %arg7[%c1_65, %c0_66, %c0_67] : memref<4x8x128xf32, #tpu.memory_space<vmem>>, vector<1x8x128xf32>
    %141 = vector.shape_cast %140 : vector<1x8x128xf32> to vector<8x128xf32>
    %cst_68 = arith.constant 0.000000e+00 : f32
    %142 = vector.broadcast %cst_68 : f32 to vector<4x128xf32>
    %143 = tpu.concatenate %139, %142 in 0 : vector<4x128xf32>, vector<4x128xf32> -> vector<8x128xf32>
    %144 = vector.shape_cast %143 : vector<8x128xf32> to vector<1x8x128xf32>
    %cst_69 = arith.constant dense<0.000000e+00> : vector<8x128xf32>
    %145 = vector.multi_reduction <add>, %144, %cst_69 [0] : vector<1x8x128xf32> to vector<8x128xf32>
    %146 = arith.addf %141, %145 : vector<8x128xf32>
    %c1_70 = arith.constant 1 : index
    %c0_71 = arith.constant 0 : index
    %c0_72 = arith.constant 0 : index
    %147 = vector.load %arg7[%c1_70, %c0_71, %c0_72] : memref<4x8x128xf32, #tpu.memory_space<vmem>>, vector<1x8x128xf32>
    %148 = vector.shape_cast %147 : vector<1x8x128xf32> to vector<8x128xf32>
    %149 = vector.shape_cast %146 : vector<8x128xf32> to vector<1x8x128xf32>
    tpu.vector_store %arg7[%c1_70, %c0_71, %c0_72], %149 {strides = array<i32>} : memref<4x8x128xf32, #tpu.memory_space<vmem>>, vector<1x8x128xf32>,
    %c2_73 = arith.constant 2 : index
    %c0_74 = arith.constant 0 : index
    %c0_75 = arith.constant 0 : index
    %150 = vector.load %arg7[%c2_73, %c0_74, %c0_75] : memref<4x8x128xf32, #tpu.memory_space<vmem>>, vector<1x8x128xf32>
    %151 = vector.shape_cast %150 : vector<1x8x128xf32> to vector<8x128xf32>
    %152 = arith.mulf %139, %6 : vector<4x128xf32>
    %cst_76 = arith.constant 0.000000e+00 : f32
    %153 = vector.broadcast %cst_76 : f32 to vector<4x128xf32>
    %154 = tpu.concatenate %152, %153 in 0 : vector<4x128xf32>, vector<4x128xf32> -> vector<8x128xf32>
    %155 = vector.shape_cast %154 : vector<8x128xf32> to vector<1x8x128xf32>
    %cst_77 = arith.constant dense<0.000000e+00> : vector<8x128xf32>
    %156 = vector.multi_reduction <add>, %155, %cst_77 [0] : vector<1x8x128xf32> to vector<8x128xf32>
    %157 = arith.addf %151, %156 : vector<8x128xf32>
    %c2_78 = arith.constant 2 : index
    %c0_79 = arith.constant 0 : index
    %c0_80 = arith.constant 0 : index
    %158 = vector.load %arg7[%c2_78, %c0_79, %c0_80] : memref<4x8x128xf32, #tpu.memory_space<vmem>>, vector<1x8x128xf32>
    %159 = vector.shape_cast %158 : vector<1x8x128xf32> to vector<8x128xf32>
    %160 = vector.shape_cast %157 : vector<8x128xf32> to vector<1x8x128xf32>
    tpu.vector_store %arg7[%c2_78, %c0_79, %c0_80], %160 {strides = array<i32>} : memref<4x8x128xf32, #tpu.memory_space<vmem>>, vector<1x8x128xf32>,
    %c3_81 = arith.constant 3 : index
    %c0_82 = arith.constant 0 : index
    %c0_83 = arith.constant 0 : index
    %161 = vector.load %arg7[%c3_81, %c0_82, %c0_83] : memref<4x8x128xf32, #tpu.memory_space<vmem>>, vector<1x8x128xf32>
    %162 = vector.shape_cast %161 : vector<1x8x128xf32> to vector<8x128xf32>
    %cst_84 = arith.constant 0.000000e+00 : f32
    %163 = vector.broadcast %cst_84 : f32 to vector<4x128xf32>
    %164 = tpu.concatenate %6, %163 in 0 : vector<4x128xf32>, vector<4x128xf32> -> vector<8x128xf32>
    %165 = vector.shape_cast %164 : vector<8x128xf32> to vector<1x8x128xf32>
    %cst_85 = arith.constant dense<0.000000e+00> : vector<8x128xf32>
    %166 = vector.multi_reduction <add>, %165, %cst_85 [0] : vector<1x8x128xf32> to vector<8x128xf32>
    %167 = arith.addf %162, %166 : vector<8x128xf32>
    %c3_86 = arith.constant 3 : index
    %c0_87 = arith.constant 0 : index
    %c0_88 = arith.constant 0 : index
    %168 = vector.load %arg7[%c3_86, %c0_87, %c0_88] : memref<4x8x128xf32, #tpu.memory_space<vmem>>, vector<1x8x128xf32>
    %169 = vector.shape_cast %168 : vector<1x8x128xf32> to vector<8x128xf32>
    %170 = vector.shape_cast %167 : vector<8x128xf32> to vector<1x8x128xf32>
    tpu.vector_store %arg7[%c3_86, %c0_87, %c0_88], %170 {strides = array<i32>} : memref<4x8x128xf32, #tpu.memory_space<vmem>>, vector<1x8x128xf32>,
    %c0_i32_89 = arith.constant 0 : i32
    %171 = arith.cmpi eq, %arg1, %c0_i32_89 : i32
    %172 = arith.extui %171 : i1 to i32
    %c0_i32_90 = arith.constant 0 : i32
    %173 = arith.cmpi ne, %172, %c0_i32_90 : i32
    scf.if %173 {
      %c0_91 = arith.constant 0 : index
      %c0_92 = arith.constant 0 : index
      %c0_93 = arith.constant 0 : index
      %174 = vector.load %arg7[%c0_91, %c0_92, %c0_93] : memref<4x8x128xf32, #tpu.memory_space<vmem>>, vector<4x8x128xf32>
      %c0_94 = arith.constant 0 : index
      %c0_95 = arith.constant 0 : index
      %c0_96 = arith.constant 0 : index
      %c0_97 = arith.constant 0 : index
      %175 = vector.load %arg6[%c0_94, %c0_95, %c0_96, %c0_97] : memref<1x4x8x128xf32, #tpu.memory_space<vmem>>, vector<1x4x8x128xf32>
      %176 = vector.shape_cast %175 : vector<1x4x8x128xf32> to vector<4x8x128xf32>
      %177 = vector.shape_cast %174 : vector<4x8x128xf32> to vector<1x4x8x128xf32>
      tpu.vector_store %arg6[%c0_94, %c0_95, %c0_96, %c0_97], %177 {strides = array<i32>} : memref<1x4x8x128xf32, #tpu.memory_space<vmem>>, vector<1x4x8x128xf32>,
    } else {
    }
    return
  }
  func.func @transform_0(%arg0: i32, %arg1: i32) -> (i32, i32) {
    %c1_i32 = arith.constant 1 : i32
    %0 = arith.muli %arg0, %c1_i32 : i32
    %1 = arith.addi %0, %arg1 : i32
    %c0_i32 = arith.constant 0 : i32
    %c0_i32_0 = arith.constant 0 : i32
    return %1, %c0_i32 : i32, i32
  }
  func.func @transform_1(%arg0: i32, %arg1: i32) -> (i32, i32) {
    %c1_i32 = arith.constant 1 : i32
    %0 = arith.muli %arg0, %c1_i32 : i32
    %1 = arith.addi %0, %arg1 : i32
    %c0_i32 = arith.constant 0 : i32
    %c0_i32_0 = arith.constant 0 : i32
    return %1, %c0_i32 : i32, i32
  }
  func.func @transform_2(%arg0: i32, %arg1: i32) -> (i32, i32, i32) {
    %c1_i32 = arith.constant 1 : i32
    %0 = arith.muli %arg0, %c1_i32 : i32
    %1 = arith.addi %0, %arg1 : i32
    %c0_i32 = arith.constant 0 : i32
    %c0_i32_0 = arith.constant 0 : i32
    %c0_i32_1 = arith.constant 0 : i32
    return %c0_i32, %1, %c0_i32_0 : i32, i32, i32
  }
  func.func @transform_3(%arg0: i32, %arg1: i32) -> (i32, i32) {
    %c1_i32 = arith.constant 1 : i32
    %0 = arith.muli %arg0, %c1_i32 : i32
    %1 = arith.addi %0, %arg1 : i32
    %c0_i32 = arith.constant 0 : i32
    %c0_i32_0 = arith.constant 0 : i32
    return %1, %c0_i32 : i32, i32
  }
  func.func @transform_4(%arg0: i32, %arg1: i32) -> (i32, i32, i32, i32) {
    %c0_i32 = arith.constant 0 : i32
    %c0_i32_0 = arith.constant 0 : i32
    %c0_i32_1 = arith.constant 0 : i32
    %c0_i32_2 = arith.constant 0 : i32
    return %arg0, %c0_i32, %c0_i32_0, %c0_i32_1 : i32, i32, i32, i32
  }
}

</mosaic_0001>

<bundles_post_ra>
// kernel: tpu_custom_call.1
= control target key start
LH: loop header
LB: loop body
LE: loop exit
PB: predicated region body
PF: predicated region fallthrough
CT: control target
= control target key end

     0   :  { %9 = vsyncpa [#allocation4], 0  ;;  %s508_s0 = inlined_call_operand.hbm [shape: bf16[4,128], index: 0, kind: input, shape index: {}]   ;;  %s509_s1 = inlined_call_operand.hbm [shape: bf16[4,128], index: 1, kind: input, shape index: {}]   ;;  %s510_s2 = inlined_call_operand.hbm [shape: bf16[8,4,128], index: 2, kind: input, shape index: {}]   ;;  %s511_s3 = inlined_call_operand.hbm [shape: s32[4,128], index: 3, kind: input, shape index: {}]   ;;  %s512_s4 = inlined_call_operand.hbm [shape: f32[1,4,8,128], index: 4, kind: output, shape index: {}]  }
   0x1   :  { %10 = vsyncpa [#allocation7], 0 }
   0x2   :  { %11 = vsyncpa [#allocation10], 0  ;;  %s35_s17 = sshll.u32 %s509_s1, 4  ;;  %s36_s17 = int_to_ptr.hbm [resolvable:$true] %s35_s17 }
   0x3   :  { %12 = vsyncpa [#allocation5], 0  ;;  %s438_s18 = smov [#allocation6]   ;;  %s21_s22 = sshll.u32 %s508_s0, 4  ;;  %s22_s22 = int_to_ptr.hbm [resolvable:$true] %s21_s22 }
   0x4   :  { %s37_s19 = sshll.u32 %s438_s18, 4  ;;  %s439_s23 = smov [#allocation3]   ;;  %s38_s19 = int_to_ptr.vmem [resolvable:$true] %s37_s19 }
   0x5   :  { %40 = dma.hbm_to_vmem [thread:$0]  %s36_s17, 32, %s38_s19, [#allocation7]  }
   0x6   :  { %s23_s24 = sshll.u32 %s439_s23, 4  ;;  %s48_s27 = sshll.u32 %s510_s2, 4  ;;  %s24_s24 = int_to_ptr.vmem [resolvable:$true] %s23_s24  ;;  %s49_s27 = int_to_ptr.hbm [resolvable:$true] %s48_s27 }
   0x7   :  { %26 = dma.hbm_to_vmem [thread:$0]  %s22_s22, 32, %s24_s24, [#allocation4]  }
   0x8   :  { %s440_s1 = smov [#allocation8]   ;;  %s65_s5 = sshll.u32 %s511_s3, 4  ;;  %s66_s5 = int_to_ptr.hbm [resolvable:$true] %s65_s5 }
   0x9   :  { %s50_s28 = sshll.u32 %s440_s1, 4  ;;  %s441_s6 = smov 32   ;;  %s51_s28 = int_to_ptr.vmem [resolvable:$true] %s50_s28 }
   0xa   :  { %s442_s0 = smov 2   ;;  %s443_s7 = smov [#allocation9]  }
   0xb   :  { %56 = dma.hbm_to_vmem [thread:$0]  %s49_s27, 256, %s51_s28, [#allocation7], %s441_s6, %s441_s6, %s442_s0  }
   0xc   :  { %s67_s8 = sshll.u32 %s443_s7, 4  ;;  %s68_s8 = int_to_ptr.vmem [resolvable:$true] %s67_s8 }
   0xd   :  { %70 = dma.hbm_to_vmem [thread:$0]  %s66_s5, 64, %s68_s8, [#allocation10]  }
   0xe   :  { %430 = dma.done.wait [#allocation4], 32  }
   0xf   :  { %431 = vsyncadd [#allocation4], 4294967264 }
  0x10   :  { %432 = dma.done.wait [#allocation7], 288  }
  0x11   :  { %433 = vsyncadd [#allocation7], 4294967008 }
  0x12   :  { %434 = dma.done.wait [#allocation10], 64  }
  0x13   :  { %435 = vsyncadd [#allocation10], 4294967232  ;;  %v99_v0 = vld [vmem:[#allocation3] sm:$0x3]  ;;  %v127_v2 = vld [vmem:[#allocation8] sm:$0x3] }
  0x14   :  { %v100_v1 = vunpack.c.l.bf16 %v99_v0  ;;  %v129_v3 = vld [vmem:[#allocation8 + $0x2] sm:$0x3]  ;;  %v135_v4 = vld [vmem:[#allocation8 + $0x4] sm:$0x3]  ;;  %v130_v5 = vunpack.c.l.bf16 %v127_v2  ;;  %v141_v8 = vld [vmem:[#allocation8 + $0x6] sm:$0x3] }
  0x15   :  { %v131_v6 = vunpack.c.l.bf16 %v129_v3  ;;  %v137_v7 = vunpack.c.l.bf16 %v135_v4  ;;  %v147_v10 = vld [vmem:[#allocation8 + $0x8] sm:$0x3]  ;;  %v143_v12 = vunpack.c.l.bf16 %v141_v8  ;;  %v153_v14 = vld [vmem:[#allocation8 + $0xa] sm:$0x3]  ;;  %v159_v18 = vld [vmem:[#allocation8 + $0xc] sm:$0x3] }
  0x16   :  { %v106_v9 = vand.u32 2147483647, %v100_v1  ;;  %v149_v16 = vunpack.c.l.bf16 %v147_v10  ;;  %v155_v20 = vunpack.c.l.bf16 %v153_v14  ;;  %v165_v21 = vld [vmem:[#allocation8 + $0xe] sm:$0x3]  ;;  %v161_v23 = vunpack.c.l.bf16 %v159_v18  ;;  %v101_v26 = vld [vmem:[#allocation6] sm:$0x3] }
  0x17   :  { %v132_v11 = vmax.f32 %v130_v5, %v131_v6  ;;  %v167_v25 = vunpack.c.l.bf16 %v165_v21  ;;  %v484_v29 = vunpack.c.l.bf16 %v101_v26  ;;  %v103_v35 = vmax.f32 %v100_v1, 0.0  ;;  %v487_v38 = vld [vmem:[#allocation9] sm:$0xf]  ;;  %s444_s2 = smov [#allocation11]   ;;  %s264_s11 = sshll.u32 %s512_s4, 4  ;;  %s265_s11 = int_to_ptr.hbm [resolvable:$true] %s264_s11 }
  0x18   :  { %v107_v13 = vsub.f32 0.0, %v106_v9  ;;  %vm121_vm0 = vcmask 1043456   ;;  %vm174_vm1 = vcmp.eq.s32.totalorder %v487_v38, 0  ;;  %vm179_vm2 = vcmp.eq.s32.totalorder %v487_v38, 1  ;;  %s262_s3 = sshll.u32 %s444_s2, 4  ;;  %s445_s12 = smov 128   ;;  %s263_s3 = int_to_ptr.vmem [resolvable:$true] %s262_s3 }
  0x19   :  { %v138_v15 = vmax.f32 %v132_v11, %v137_v7  ;;  %v104_v36 = vmul.f32 %v484_v29, %v100_v1  ;;  %vm186_vm4 = vcmp.eq.s32.totalorder %v487_v38, 2  ;;  %vm193_vm5 = vcmp.eq.s32.totalorder %v487_v38, 3  ;;  %s446_s13 = smov 8  }
  0x1a   :  { %v108_v17 = vmul.f32 1.442695, %v107_v13  ;;  %v243_v2 = vsel %vm121_vm0, %v484_v29, 0.0  ;;  %vm200_vm6 = vcmp.eq.s32.totalorder %v487_v38, 4  ;;  %vm207_vm7 = vcmp.eq.s32.totalorder %v487_v38, 5 }
  0x1b   :  { %v144_v19 = vmax.f32 %v138_v15, %v143_v12  ;;  %v105_v47 = vsub.f32 %v103_v35, %v104_v36  ;;  %257 = vst [vmem:[#allocation11 + $0x18] sm:$0xff] %v243_v2  ;;  %vm214_vm8 = vcmp.eq.s32.totalorder %v487_v38, 6  ;;  %vm221_vm9 = vcmp.eq.s32.totalorder %v487_v38, 7 }
  0x1c   :  { %288 = vpow2.f32 %v108_v17 }
  0x1d   :  { %v150_v22 = vmax.f32 %v144_v19, %v149_v16 }
  0x1f   :  { %v156_v24 = vmax.f32 %v150_v22, %v155_v20 }
  0x21   :  { %v162_v27 = vmax.f32 %v156_v24, %v161_v23 }
  0x22   :  { %v289_v28 = vpop.eup %288 }
  0x23   :  { %v110_v30 = vadd.f32 1.0, %v289_v28  ;;  %v113_v31 = vmul.f32 -0.5, %v289_v28  ;;  %v168_v32 = vmax.f32 %v162_v27, %v167_v25  ;;  %v116_v37 = vand.u32 2147483647, %v289_v28 }
  0x25   :  { %290 = vlog2.f32 %v110_v30  ;;  %v169_v33 = vpack.c.bf16 %v168_v32, %v168_v32  ;;  %v114_v34 = vadd.f32 1.0, %v113_v31  ;;  %vm117_vm3 = vcmp.lt.f32.partialorder %v116_v37, 0.0004427343 }
  0x27   :  { %v170_v39 = vunpack.c.l.bf16 %v169_v33  ;;  %v115_v44 = vmul.f32 %v289_v28, %v114_v34 }
  0x29   :  { %v171_v40 = vsub.f32 %v130_v5, %v170_v39  ;;  %v176_v41 = vsub.f32 %v131_v6, %v170_v39  ;;  %v183_v42 = vsub.f32 %v137_v7, %v170_v39  ;;  %v190_v43 = vsub.f32 %v143_v12, %v170_v39 }
  0x2a   :  { %v197_v45 = vsub.f32 %v149_v16, %v170_v39  ;;  %v204_v52 = vsub.f32 %v155_v20, %v170_v39  ;;  %v211_v58 = vsub.f32 %v161_v23, %v170_v39  ;;  %v218_v62 = vsub.f32 %v167_v25, %v170_v39 }
  0x2b   :  { %v291_v46 = vpop.eup %290  ;;  %v172_v48 = vmul.f32 1.442695, %v171_v40  ;;  %v177_v49 = vmul.f32 1.442695, %v176_v41  ;;  %v184_v51 = vmul.f32 1.442695, %v183_v42 }
  0x2c   :  { %v112_v50 = vmul.f32 0.6931472, %v291_v46  ;;  %v175_v53 = vsel %vm174_vm1, %v171_v40, 0.0  ;;  %v180_v54 = vsel %vm179_vm2, %v176_v41, 0.0  ;;  %v191_v55 = vmul.f32 1.442695, %v190_v43 }
  0x2d   :  { %292 = vpow2.f32 %v172_v48  ;;  %v198_v57 = vmul.f32 1.442695, %v197_v45  ;;  %v182_v60 = vadd.f32 %v180_v54, %v175_v53  ;;  %v205_v61 = vmul.f32 1.442695, %v204_v52 }
  0x2e   :  { %v118_v56 = vsel %vm117_vm3, %v115_v44, %v112_v50  ;;  %294 = vpow2.f32 %v177_v49  ;;  %v187_v0 = vsel %vm186_vm4, %v183_v42, 0.0  ;;  %v212_v1 = vmul.f32 1.442695, %v211_v58 }
  0x2f   :  { %v119_v59 = vadd.f32 %v118_v56, %v105_v47  ;;  %296 = vpow2.f32 %v184_v51  ;;  %v189_v5 = vadd.f32 %v187_v0, %v182_v60  ;;  %v219_v6 = vmul.f32 1.442695, %v218_v62 }
  0x30   :  { %298 = vpow2.f32 %v191_v55  ;;  %v194_v9 = vsel %vm193_vm5, %v190_v43, 0.0  ;;  %v201_v15 = vsel %vm200_vm6, %v197_v45, 0.0  ;;  %v208_v20 = vsel %vm207_vm7, %v204_v52, 0.0 }
  0x31   :  { %v122_v63 = vsel %vm121_vm0, %v119_v59, 0.0  ;;  %300 = vpow2.f32 %v198_v57  ;;  %v196_v13 = vadd.f32 %v194_v9, %v189_v5  ;;  %v215_v25 = vsel %vm214_vm8, %v211_v58, 0.0 }
  0x32   :  { %254 = vst [vmem:[#allocation11] sm:$0xff] %v122_v63  ;;  %302 = vpow2.f32 %v205_v61  ;;  %v222_v28 = vsel %vm221_vm9, %v218_v62, 0.0 }
  0x33   :  { %v293_v3 = vpop.eup %292  ;;  %304 = vpow2.f32 %v212_v1  ;;  %v203_v19 = vadd.f32 %v201_v15, %v196_v13 }
  0x34   :  { %v295_v4 = vpop.eup %294  ;;  %306 = vpow2.f32 %v219_v6 }
  0x35   :  { %v297_v7 = vpop.eup %296  ;;  %v181_v8 = vadd.f32 %v295_v4, %v293_v3  ;;  %v210_v24 = vadd.f32 %v208_v20, %v203_v19 }
  0x36   :  { %v299_v10 = vpop.eup %298 }
  0x37   :  { %v188_v11 = vadd.f32 %v297_v7, %v181_v8  ;;  %v301_v12 = vpop.eup %300  ;;  %v217_v27 = vadd.f32 %v215_v25, %v210_v24 }
  0x38   :  { %v303_v16 = vpop.eup %302 }
  0x39   :  { %v195_v14 = vadd.f32 %v299_v10, %v188_v11  ;;  %v305_v18 = vpop.eup %304  ;;  %v224_v30 = vadd.f32 %v222_v28, %v217_v27 }
  0x3a   :  { %v307_v22 = vpop.eup %306 }
  0x3b   :  { %v202_v17 = vadd.f32 %v301_v12, %v195_v14 }
  0x3d   :  { %v209_v21 = vadd.f32 %v303_v16, %v202_v17 }
  0x3f   :  { %v216_v23 = vadd.f32 %v305_v18, %v209_v21 }
  0x41   :  { %v223_v26 = vadd.f32 %v307_v22, %v216_v23 }
  0x43   :  { %308 = vlog2.f32 %v223_v26 }
  0x49   :  { %v309_v31 = vpop.eup %308 }
  0x4a   :  { %v226_v32 = vmul.f32 0.6931472, %v309_v31 }
  0x4c   :  { %v227_v33 = vsub.f32 %v226_v32, %v224_v30 }
  0x4e   :  { %v230_v34 = vsel %vm121_vm0, %v227_v33, 0.0  ;;  %v236_v35 = vmul.f32 %v227_v33, %v484_v29 }
  0x4f   :  { %255 = vst [vmem:[#allocation11 + $0x8] sm:$0xff] %v230_v34 }
  0x50   :  { %v237_v36 = vsel %vm121_vm0, %v236_v35, 0.0 }
  0x51   :  { %256 = vst [vmem:[#allocation11 + $0x10] sm:$0xff] %v237_v36 }
  0x52   :  { %270 = dma.vmem_to_hbm [thread:$0]  %s263_s3, 512, %s265_s11, [#allocation5], %s445_s12, %s445_s12, %s446_s13  }
  0x53   :  { %436 = dma.done.wait [#allocation5], 512  }
  0x54   :  { %437 = vsyncadd [#allocation5], 4294966784 }
  0x55   :  { %275 = vsyncpa [#allocation4], 1 }
  0x56   :  { %276 = vsyncpa [#allocation7], 1 }
  0x57   :  { %277 = vsyncpa [#allocation10], 1 }
  0x58   :  { %278 = vsyncpa [#allocation5], 1 }

</bundles_post_ra>
